<compile_context>
chip_gen: v6e
topology: v6e:2x2x1
jax: 0.10.0
libtpu: 0.0.40
codegen_flags: <defaults>
</compile_context>

<pallas_src>
import functools

import jax
import jax.numpy as jnp
from jax.experimental import pallas as pl
from jax.experimental.pallas import tpu as pltpu


def _round_up(v, m):
    return (v + m - 1) // m * m


def transform_block_kernel(x_ref, w1_ref, b1_ref, w2_ref, b2_ref, o_ref):
    """Fused residual MLP tile: o = x + relu(x @ W1 + b1) @ W2 + b2."""
    x = x_ref[...]                                        # [TILE_N, Hp] f32
    # First matmul on the MXU: bf16 operands, f32 accumulation.
    h = jnp.dot(x.astype(jnp.bfloat16), w1_ref[...],
                preferred_element_type=jnp.float32)       # [TILE_N, Hhp]
    # Bias + ReLU in f32 on the VPU.
    h = jnp.maximum(h + b1_ref[...], 0.0)
    # Second matmul on the MXU (post-ReLU activations rounded to bf16).
    y = jnp.dot(h.astype(jnp.bfloat16), w2_ref[...],
                preferred_element_type=jnp.float32)       # [TILE_N, Hp]
    # Bias + residual in f32, then cast to the output dtype.
    o_ref[...] = (x + y + b2_ref[...]).astype(o_ref.dtype)


def _choose_tile_n(n_rows, hp, hhp, budget_bytes):
    """Largest row tile (multiple of 8) that fits the VMEM budget."""
    # Resident bf16 weights, double-buffered by the pipeline.
    weight_bytes = 2 * 2 * (hp * hhp + hhp * hp)
    # Per-row streaming cost: double-buffered f32 x and out tiles plus the
    # f32 / bf16 intermediates materialized inside the kernel body.
    per_row = 2 * 4 * hp + 2 * 4 * hp + 4 * hhp + 2 * hhp + 2 * hp
    avail = max(budget_bytes - weight_bytes, per_row * 8)
    tile = max(8, (avail // per_row) // 8 * 8)
    tile = min(tile, 1024)                       # diminishing returns past ~1k rows
    tile = min(tile, _round_up(n_rows, 8))       # don't exceed the padded problem
    return tile


@functools.partial(jax.jit, static_argnames=("vmem_budget_bytes",))
def transform_block(x, w1, b1, w2, b2, *, vmem_budget_bytes=24 * 1024 * 1024):
    """x: [N, H]; w1: [H, Hh]; b1: [Hh]; w2: [Hh, H]; b2: [H]. Returns [N, H]."""
    N, H = x.shape
    Hh = w1.shape[1]

    # Lane-dense padding of the hidden dims (zero padding is inert: padded
    # hidden columns stay 0 through ReLU, padded output columns stay 0).
    Hp = _round_up(H, 128)
    Hhp = _round_up(Hh, 128)

    w1p = jnp.pad(w1.astype(jnp.bfloat16), ((0, Hp - H), (0, Hhp - Hh)))
    w2p = jnp.pad(w2.astype(jnp.bfloat16), ((0, Hhp - Hh), (0, Hp - H)))
    b1p = jnp.pad(b1.astype(jnp.float32), (0, Hhp - Hh)).reshape(1, Hhp)
    b2p = jnp.pad(b2.astype(jnp.float32), (0, Hp - H)).reshape(1, Hp)

    tile_n = _choose_tile_n(N, Hp, Hhp, vmem_budget_bytes)
    Np = _round_up(N, tile_n)
    xp = jnp.pad(x.astype(jnp.float32), ((0, Np - N), (0, Hp - H)))

    grid = (Np // tile_n,)

    out = pl.pallas_call(
        transform_block_kernel,
        out_shape=jax.ShapeDtypeStruct((Np, Hp), x.dtype),
        grid=grid,
        in_specs=[
            pl.BlockSpec((tile_n, Hp), lambda i: (i, 0)),   # x: streamed over rows
            pl.BlockSpec((Hp, Hhp), lambda i: (0, 0)),      # w1: resident
            pl.BlockSpec((1, Hhp), lambda i: (0, 0)),       # b1: resident
            pl.BlockSpec((Hhp, Hp), lambda i: (0, 0)),      # w2: resident
            pl.BlockSpec((1, Hp), lambda i: (0, 0)),        # b2: resident
        ],
        out_specs=pl.BlockSpec((tile_n, Hp), lambda i: (i, 0)),
        compiler_params=pltpu.CompilerParams(
            dimension_semantics=("parallel",),              # shard rows across TCs
            vmem_limit_bytes=48 * 1024 * 1024,              # safe on v5e/v6e/v7x
        ),
    )(xp, w1p, b1p, w2p, b2p)

    return out[:N, :H]


if __name__ == "__main__":
    # Module hyperparameters (small, consistent with the PyTorch forward).
    hinp = 32
    factor = 2
    hidden = int(hinp * factor)   # 64
    batch, seq = 2, 8

    key = jax.random.PRNGKey(0)
    kx, k1, k2, k3, k4 = jax.random.split(key, 5)

    # Deterministic synthetic parameters, scaled ~1/sqrt(fan_in) like nn.Linear.
    w1 = jax.random.uniform(k1, (hinp, hidden), jnp.float32,
                            minval=-1.0, maxval=1.0) / jnp.sqrt(float(hinp))
    b1 = jax.random.uniform(k2, (hidden,), jnp.float32,
                            minval=-1.0, maxval=1.0) / jnp.sqrt(float(hinp))
    w2 = jax.random.uniform(k3, (hidden, hinp), jnp.float32,
                            minval=-1.0, maxval=1.0) / jnp.sqrt(float(hidden))
    b2 = jax.random.uniform(k4, (hinp,), jnp.float32,
                            minval=-1.0, maxval=1.0) / jnp.sqrt(float(hidden))

    # Input: [batch, seq, hinp] -> flatten leading dims to rows.
    x = jax.random.normal(kx, (batch, seq, hinp), jnp.float32)
    x_flat = x.reshape(batch * seq, hinp)

    out_flat = transform_block(x_flat, w1, b1, w2, b2)
    out = out_flat.reshape(batch, seq, hinp)
    jax.block_until_ready(out)

    # Pure-JAX f32 reference (eval-mode dropout == identity).  Tolerance is
    # loosened because the MXU operands are fed as bf16 (f32 accumulation).
    ref = x + (jnp.maximum(x @ w1 + b1, 0.0) @ w2 + b2)
    assert jnp.allclose(out, ref, atol=3e-2, rtol=3e-2), "mismatch vs reference"

    print("KERNEL_OK")
</pallas_src>

<mosaic_0001>
module attributes {stable_mosaic.version = 11 : i64} {
  func.func @transform_block_kernel(%arg0: i32, %arg1: memref<16x128xf32, #tpu.memory_space<vmem>>, %arg2: memref<128x128xbf16, #tpu.memory_space<vmem>>, %arg3: memref<1x128xf32, #tpu.memory_space<vmem>>, %arg4: memref<128x128xbf16, #tpu.memory_space<vmem>>, %arg5: memref<1x128xf32, #tpu.memory_space<vmem>>, %arg6: memref<16x128xf32, #tpu.memory_space<vmem>>) attributes {dimension_semantics = [#tpu.dimension_semantics<parallel>], iteration_bounds = array<i64: 1>, scalar_prefetch = 0 : i64, scratch_operands = 0 : i64, tpu.core_type = #tpu.core_type<tc>, window_params = [{transform_indices = @transform_0, window_bounds = array<i64: 16, 128>}, {pipeline_mode = #tpu.pipeline_mode<synchronous>, transform_indices = @transform_1, window_bounds = array<i64: 128, 128>}, {pipeline_mode = #tpu.pipeline_mode<synchronous>, transform_indices = @transform_2, window_bounds = array<i64: 1, 128>}, {pipeline_mode = #tpu.pipeline_mode<synchronous>, transform_indices = @transform_3, window_bounds = array<i64: 128, 128>}, {pipeline_mode = #tpu.pipeline_mode<synchronous>, transform_indices = @transform_4, window_bounds = array<i64: 1, 128>}, {transform_indices = @transform_5, window_bounds = array<i64: 16, 128>}]} {
    %c0 = arith.constant 0 : index
    %c0_0 = arith.constant 0 : index
    %0 = vector.load %arg1[%c0, %c0_0] : memref<16x128xf32, #tpu.memory_space<vmem>>, vector<16x128xf32>
    %1 = arith.truncf %0 : vector<16x128xf32> to vector<16x128xbf16>
    %c0_1 = arith.constant 0 : index
    %c0_2 = arith.constant 0 : index
    %2 = vector.load %arg2[%c0_1, %c0_2] : memref<128x128xbf16, #tpu.memory_space<vmem>>, vector<128x128xbf16>
    %cst = arith.constant dense<0.000000e+00> : vector<16x128xf32>
    %3 = tpu.matmul %1, %2, %cst {dimension_numbers = #tpu.dot_dimension_numbers<[1], [0], [0], [1], [0, 0, 1, 1], [], []>} : vector<16x128xbf16>, vector<128x128xbf16>, vector<16x128xf32> -> vector<16x128xf32>
    %c0_3 = arith.constant 0 : index
    %c0_4 = arith.constant 0 : index
    %4 = vector.load %arg3[%c0_3, %c0_4] : memref<1x128xf32, #tpu.memory_space<vmem>>, vector<1x128xf32>
    %5 = vector.broadcast %4 : vector<1x128xf32> to vector<16x128xf32>
    %6 = arith.addf %3, %5 : vector<16x128xf32>
    %cst_5 = arith.constant 0.000000e+00 : f32
    %7 = vector.broadcast %cst_5 : f32 to vector<16x128xf32>
    %8 = arith.maximumf %6, %7 : vector<16x128xf32>
    %9 = arith.truncf %8 : vector<16x128xf32> to vector<16x128xbf16>
    %c0_6 = arith.constant 0 : index
    %c0_7 = arith.constant 0 : index
    %10 = vector.load %arg4[%c0_6, %c0_7] : memref<128x128xbf16, #tpu.memory_space<vmem>>, vector<128x128xbf16>
    %cst_8 = arith.constant dense<0.000000e+00> : vector<16x128xf32>
    %11 = tpu.matmul %9, %10, %cst_8 {dimension_numbers = #tpu.dot_dimension_numbers<[1], [0], [0], [1], [0, 0, 1, 1], [], []>} : vector<16x128xbf16>, vector<128x128xbf16>, vector<16x128xf32> -> vector<16x128xf32>
    %12 = arith.addf %0, %11 : vector<16x128xf32>
    %c0_9 = arith.constant 0 : index
    %c0_10 = arith.constant 0 : index
    %13 = vector.load %arg5[%c0_9, %c0_10] : memref<1x128xf32, #tpu.memory_space<vmem>>, vector<1x128xf32>
    %14 = vector.broadcast %13 : vector<1x128xf32> to vector<16x128xf32>
    %15 = arith.addf %12, %14 : vector<16x128xf32>
    %c0_11 = arith.constant 0 : index
    %c0_12 = arith.constant 0 : index
    %16 = vector.load %arg6[%c0_11, %c0_12] : memref<16x128xf32, #tpu.memory_space<vmem>>, vector<16x128xf32>
    tpu.vector_store %arg6[%c0_11, %c0_12], %15 {strides = array<i32>} : memref<16x128xf32, #tpu.memory_space<vmem>>, vector<16x128xf32>,
    return
  }
  func.func @transform_0(%arg0: i32) -> (i32, i32) {
    %c0_i32 = arith.constant 0 : i32
    %c0_i32_0 = arith.constant 0 : i32
    return %arg0, %c0_i32 : i32, i32
  }
  func.func @transform_1(%arg0: i32) -> (i32, i32) {
    %c0_i32 = arith.constant 0 : i32
    %c0_i32_0 = arith.constant 0 : i32
    %c0_i32_1 = arith.constant 0 : i32
    return %c0_i32, %c0_i32_0 : i32, i32
  }
  func.func @transform_2(%arg0: i32) -> (i32, i32) {
    %c0_i32 = arith.constant 0 : i32
    %c0_i32_0 = arith.constant 0 : i32
    %c0_i32_1 = arith.constant 0 : i32
    return %c0_i32, %c0_i32_0 : i32, i32
  }
  func.func @transform_3(%arg0: i32) -> (i32, i32) {
    %c0_i32 = arith.constant 0 : i32
    %c0_i32_0 = arith.constant 0 : i32
    %c0_i32_1 = arith.constant 0 : i32
    return %c0_i32, %c0_i32_0 : i32, i32
  }
  func.func @transform_4(%arg0: i32) -> (i32, i32) {
    %c0_i32 = arith.constant 0 : i32
    %c0_i32_0 = arith.constant 0 : i32
    %c0_i32_1 = arith.constant 0 : i32
    return %c0_i32, %c0_i32_0 : i32, i32
  }
  func.func @transform_5(%arg0: i32) -> (i32, i32) {
    %c0_i32 = arith.constant 0 : i32
    %c0_i32_0 = arith.constant 0 : i32
    return %arg0, %c0_i32 : i32, i32
  }
}

</mosaic_0001>

<bundles_post_ra>
// kernel: transform_block.1
= control target key start
LH: loop header
LB: loop body
LE: loop exit
PB: predicated region body
PF: predicated region fallthrough
CT: control target
= control target key end

     0   :  { %v393_v1 = vmov 0.0   ;;  %vm394_vm0 = vmmov 0   ;;  %s491_s0 = inlined_call_operand.vmem [shape: f32[16,128], index: 0, kind: input, shape index: {}]   ;;  %s492_s1 = inlined_call_operand.vmem [shape: bf16[128,128], index: 1, kind: input, shape index: {}]   ;;  %s493_s2 = inlined_call_operand.vmem [shape: f32[1,128], index: 2, kind: input, shape index: {}]   ;;  %s494_s3 = inlined_call_operand.vmem [shape: bf16[128,128], index: 3, kind: input, shape index: {}]   ;;  %s495_s4 = inlined_call_operand.vmem [shape: f32[1,128], index: 4, kind: input, shape index: {}]   ;;  %s496_s5 = inlined_call_operand.hbm [shape: f32[16,128], index: 5, kind: output, shape index: {}]  }
   0x1   :  { %v355_v0 = vld [vmem:[%s492_s1 + $0x38] sm:$0xff]   ;;  %310 = vmatprep.subr.bf16.mxu0 %v393_v1  ;;  %330 = vmatprep.subr.bf16.mxu1 %v393_v1  ;;  %v356_v2 = vld [vmem:[%s492_s1 + $0x30] sm:$0xff]   ;;  %v357_v3 = vld [vmem:[%s492_s1 + $0x28] sm:$0xff]  }
   0x2   :  { %311 = vmatpush3.bf16.msra.mxu0 %v355_v0  ;;  %326 = vmatprep.mubr.msk.bf16.mxu0 %vm394_vm0, %v393_v1  ;;  %v363_v4 = vld [vmem:[%s494_s3 + $0x38] sm:$0xff]   ;;  %v358_v5 = vld [vmem:[%s492_s1 + $0x20] sm:$0xff]   ;;  %v364_v6 = vld [vmem:[%s494_s3 + $0x30] sm:$0xff]  }
   0x3   :  { %312 = vmatprep.subr.bf16.mxu0 %v393_v1  ;;  %346 = vmatprep.mubr.msk.bf16.mxu1 %vm394_vm0, %v393_v1  ;;  %v359_v7 = vld [vmem:[%s492_s1 + $0x18] sm:$0xff]   ;;  %v365_v8 = vld [vmem:[%s494_s3 + $0x28] sm:$0xff]  }
   0x4   :  { %331 = vmatpush3.bf16.msra.mxu1 %v363_v4 }
   0x5   :  { %332 = vmatprep.subr.bf16.mxu1 %v393_v1 }
   0x6   :  { %313 = vmatpush3.bf16.msra.mxu0 %v356_v2 }
   0x7   :  { %314 = vmatprep.subr.bf16.mxu0 %v393_v1 }
   0x8   :  { %333 = vmatpush3.bf16.msra.mxu1 %v364_v6 }
   0x9   :  { %334 = vmatprep.subr.bf16.mxu1 %v393_v1 }
   0xa   :  { %315 = vmatpush3.bf16.msra.mxu0 %v357_v3 }
   0xb   :  { %316 = vmatprep.subr.bf16.mxu0 %v393_v1 }
   0xe   :  { %317 = vmatpush3.bf16.msra.mxu0 %v358_v5 }
   0xf   :  { %318 = vmatprep.subr.bf16.mxu0 %v393_v1 }
  0x10   :  { %10 = vsyncpa [#allocation3], 0  ;;  %v360_v9 = vld [vmem:[%s492_s1 + $0x10] sm:$0xff]   ;;  %335 = vmatpush3.bf16.msra.mxu1 %v365_v8  ;;  %v366_v10 = vld [vmem:[%s494_s3 + $0x20] sm:$0xff]  }
  0x11   :  { %336 = vmatprep.subr.bf16.mxu1 %v393_v1  ;;  %v361_v11 = vld [vmem:[%s492_s1 + $0x8] sm:$0xff]   ;;  %v367_v12 = vld [vmem:[%s494_s3 + $0x18] sm:$0xff]   ;;  %v362_v13 = vld [vmem:[%s492_s1] sm:$0xff]  }
  0x12   :  { %319 = vmatpush3.bf16.msra.mxu0 %v359_v7  ;;  %v22_v14 = vld [vmem:[%s491_s0] sm:$0xff]  ;;  %v23_v15 = vld [vmem:[%s491_s0 + $0x8] sm:$0xff]  ;;  %v368_v17 = vld [vmem:[%s494_s3 + $0x10] sm:$0xff]  }
  0x13   :  { %320 = vmatprep.subr.bf16.mxu0 %v393_v1  ;;  %v24_v16 = vpack.c.bf16 %v23_v15, %v22_v14  ;;  %v369_v18 = vld [vmem:[%s494_s3 + $0x8] sm:$0xff]   ;;  %v370_v19 = vld [vmem:[%s494_s3] sm:$0xff]   ;;  %s395_s3 = smov [#allocation2]  }
  0x14   :  { %337 = vmatpush3.bf16.msra.mxu1 %v366_v10  ;;  %v274_v20 = vld [vmem:[%s493_s2] ss:$0 sm:$0xff]  ;;  %s263_s2 = sshll.u32 %s395_s3, 4  ;;  %s264_s2 = int_to_ptr.vmem [resolvable:$true] %s263_s2 }
  0x15   :  { %338 = vmatprep.subr.bf16.mxu1 %v393_v1  ;;  %v291_v31 = vld [vmem:[%s495_s4] ss:$0 sm:$0xff]  ;;  %s371_s6 = scalar_lea.vmem %s264_s2, 256  ;;  %p376_p1 = scmp.lt.s32.totalorder %s264_s2, %s264_s2 }
  0x16   :  { %321 = vmatpush3.bf16.msra.mxu0 %v360_v9  ;;  %p372_p0 = scmp.ne.s32.totalorder %s264_s2, %s371_s6  ;;  %p377_p2 = scmp.lt.s32.totalorder %s371_s6, %s371_s6 }
  0x17   :  { %322 = vmatprep.subr.bf16.mxu0 %v393_v1 }
  0x18   :  { %339 = vmatpush3.bf16.msra.mxu1 %v367_v12  ;;  %p378_p3 = por %p377_p2, %p376_p1 }
  0x19   :  { %340 = vmatprep.subr.bf16.mxu1 %v393_v1 }
  0x1a   :  { %323 = vmatpush3.bf16.msra.mxu0 %v361_v11  ;;  %p379_p4 = pnand %p378_p3, %p372_p0 }
  0x1b   :  { %324 = vmatprep.subr.bf16.mxu0 %v393_v1 }
  0x1c   :  { %341 = vmatpush3.bf16.msra.mxu1 %v368_v17 }
  0x1d   :  { %342 = vmatprep.subr.bf16.mxu1 %v393_v1 }
  0x1e   :  { %325 = vmatpush3.bf16.msra.mxu0 %v362_v13 }
  0x20   :  { %343 = vmatpush3.bf16.msra.mxu1 %v369_v18 }
  0x21   :  { %327 = vmatmul.mubr.bf16.vlgmr.msra.gmra.mxu0 %v24_v16  ;;  %344 = vmatprep.subr.bf16.mxu1 %v393_v1 }
  0x24   :  { %345 = vmatpush3.bf16.msra.mxu1 %v370_v19 }
  0xe1   :  { %v130_v21 = vpop.f32.mrf.mxu0 }
  0xe2   :  { %v131_v23 = vadd.f32 %v274_v20, %v130_v21 }
  0xe3   :  { %v328_v22 = vpop.f32.mrf.mxu0 }
  0xe4   :  { %v137_v27 = vmax.f32 %v131_v23, 0.0 }
  0xe5   :  { %v133_v24 = vpop.f32.mrf.mxu0 }
  0xe6   :  { %v134_v25 = vadd.f32 %v274_v20, %v133_v24 }
  0xe7   :  { %v329_v26 = vpop.f32.mrf.mxu0 }
  0xe8   :  { %v138_v28 = vmax.f32 %v134_v25, 0.0 }
  0xea   :  { %v139_v29 = vpack.c.bf16 %v138_v28, %v137_v27 }
  0xec   :  { %347 = vmatmul.mubr.bf16.vlgmr.msra.gmra.mxu1 %v139_v29 }
 0x1ac   :  { %v238_v30 = vpop.f32.mrf.mxu1 }
 0x1ad   :  { %v245_v32 = vadd.f32 %v238_v30, %v22_v14 }
 0x1ae   :  { %v348_v33 = vpop.f32.mrf.mxu1 }
 0x1af   :  { %v254_v34 = vadd.f32 %v291_v31, %v245_v32 }
 0x1b0   :  { %v241_v35 = vpop.f32.mrf.mxu1 }
 0x1b1   :  { %256 = vst [vmem:[#allocation2] sm:$0xff] %v254_v34  ;;  %v246_v36 = vadd.f32 %v241_v35, %v23_v15 }
 0x1b2   :  { %v349_v37 = vpop.f32.mrf.mxu1 }
 0x1b3   :  { %v255_v38 = vadd.f32 %v291_v31, %v246_v36 }
 0x1b5   :  { %257 = vst [vmem:[#allocation2 + $0x8] sm:$0xff] %v255_v38 }
 0x1b6   :  { %382 = shalt.err (!%p379_p4)
}
 0x1b7   :  { %s396_s4 = smov 128   ;;  %s397_s7 = smov 8  }
 0x1b8   :  { %269 = dma.vmem_to_hbm [thread:$0]  %s264_s2, 256, %s496_s5, [#allocation3], %s396_s4, %s396_s4, %s397_s7  }
 0x1b9   :  { %391 = dma.done.wait [#allocation3], 256  }
 0x1ba   :  { %392 = vsyncadd [#allocation3], 4294967040 }
 0x1bb   :  { %273 = vsyncpa [#allocation3], 1 }

</bundles_post_ra>
